<compile_context>
chip_gen: v7x
topology: tpu7x:2x2x1
jax: 0.10.0
libtpu: 0.0.40
codegen_flags: <defaults>
</compile_context>

<pallas_src>
import functools

import jax
import jax.numpy as jnp
from jax.experimental import pallas as pl
from jax.experimental.pallas import tpu as pltpu


# Approximate EUP pushes per element for the cost estimate (advisory only).
_EUP_PER_ELEM = {
    "relu": 0,
    "leaky_relu": 0,
    "tanh": 1,
    "sigmoid": 1,
    "elu": 1,
    "swish": 2,
    "mish": 3,
}


def _apply_activation(h, activation):
    if activation == "relu":
        return jnp.maximum(h, 0.0)
    elif activation == "tanh":
        return jnp.tanh(h)
    elif activation == "sigmoid":
        return jax.nn.sigmoid(h)
    elif activation == "leaky_relu":
        return jnp.where(h >= 0.0, h, 0.01 * h)        # nn.LeakyReLU default slope
    elif activation == "elu":
        return jnp.where(h >= 0.0, h, jnp.expm1(h))    # nn.ELU default alpha=1
    elif activation == "swish":
        return h * jax.nn.sigmoid(h)
    elif activation == "mish":
        return h * jnp.tanh(jax.nn.softplus(h))
    else:
        raise ValueError(f"Unknown activation: {activation}")


def simple_nn_kernel(x_ref, w1t_ref, b1_ref, w2_ref, b2_ref, ot_ref, *, activation):
    # Layer 1 on the MXU, contracting x's last (feature) axis in place so the
    # wrapper never materializes a transposed copy of x.  Result is (H, TB):
    # hidden on sublanes, batch lane-dense.
    h = jax.lax.dot_general(
        w1t_ref[...], x_ref[...],
        dimension_numbers=(((1,), (1,)), ((), ())),
        preferred_element_type=jnp.float32,
    )
    h = h + b1_ref[...]                                  # (H, 1) broadcast over lanes
    h = _apply_activation(h, activation)
    # TODO(synk): nn.Dropout is identity in eval mode; training-mode dropout
    # (pltpu.prng_* masking) is not implemented here.
    # Output layer has out_features == 1: an N=1 MXU matmul wastes the array,
    # so do it as a VPU multiply + sublane (XLU) reduce over H instead.
    out = jnp.sum(h * w2_ref[...], axis=0, keepdims=True)   # (1, TB), lane-dense
    out = out + b2_ref[0, 0]                                 # scalar bias from SMEM
    ot_ref[...] = out.astype(ot_ref.dtype)


def _round_up(n, m):
    return ((n + m - 1) // m) * m


def _ceil_div(a, b):
    return -(-a // b)


def simple_nn_forward(x, w1, b1, w2, b2, *, activation="relu"):
    """SimpleNN forward pass (eval mode).

    x:  (B, D) f32
    w1: (D, H)  = layer1.weight^T     b1: (1, H) or (H,)  = layer1.bias
    w2: (H, 1)  = output.weight^T     b2: (1, 1) or scalar = output.bias
    returns (B, 1)
    """
    B, D = x.shape
    H = w1.shape[1]

    # ---- batch tile selection -------------------------------------------
    # Stream ~2 MiB of x per grid step so the ~0.35us fixed per-step overhead
    # is amortized.
    bytes_per_row = 4 * D
    tb_stream = _round_up(_ceil_div(2 << 20, bytes_per_row), 128)
    # VMEM budget: double-buffered x tiles + resident weights + output tiles
    # must stay under ~40 MiB so we fit v7x's 64 MiB physical VMEM (v5e/v6e
    # have 128 MiB, so this is conservative there).
    weight_bytes = 2 * 4 * H * D + 4 * 4 * H + (64 << 10)
    # TODO(synk): if weight_bytes ever exceeds the VMEM budget (very large
    # H*D), tile D on a second "arbitrary" grid axis with a VMEM accumulator
    # instead of one resident (H, D) block.
    x_budget = max(1 << 20, (40 << 20) - weight_bytes)
    tb_vmem = max(128, (x_budget // (2 * bytes_per_row)) // 128 * 128)
    tb_target = max(128, min(tb_stream, tb_vmem))

    # Choose the grid so padding never exceeds ~128 rows per step.
    n_steps = max(1, _ceil_div(B, tb_target))
    tb = _round_up(_ceil_div(B, n_steps), 128)
    b_pad = n_steps * tb

    # x stays in its native (B, D) layout; pad only the batch axis if needed.
    x_in = x if b_pad == B else jnp.pad(x, ((0, b_pad - B), (0, 0)))

    w1t = jnp.asarray(w1).T.reshape(H, D)        # == layer1.weight, (H, D); tiny copy
    b1c = jnp.asarray(b1).reshape(H, 1)
    w2c = jnp.asarray(w2).reshape(H, 1)
    b2s = jnp.asarray(b2).reshape(1, 1)

    eup = _EUP_PER_ELEM.get(activation, 1)
    cost = pl.CostEstimate(
        flops=2 * b_pad * H * D + 4 * b_pad * H,
        transcendentals=eup * b_pad * H,
        bytes_accessed=4 * (b_pad * D + H * D + 2 * H + 1 + b_pad),
    )

    # Explicit scoped-VMEM limit so larger tiles compile on v5e (16 MiB
    # default) while staying within v7x's 64 MiB physical VMEM.
    vmem_needed = 2 * tb * bytes_per_row + weight_bytes + 2 * 4 * tb + (2 << 20)
    vmem_limit = int(min(48 << 20, max(vmem_needed, 16 << 20)))

    kernel = functools.partial(simple_nn_kernel, activation=activation)
    out_t = pl.pallas_call(
        kernel,
        out_shape=jax.ShapeDtypeStruct((1, b_pad), x.dtype),
        grid=(n_steps,),
        in_specs=[
            pl.BlockSpec((tb, D), lambda i: (i, 0)),             # x tile (pipelined)
            pl.BlockSpec((H, D), lambda i: (0, 0)),              # layer1 weight (resident)
            pl.BlockSpec((H, 1), lambda i: (0, 0)),              # layer1 bias   (resident)
            pl.BlockSpec((H, 1), lambda i: (0, 0)),              # output weight (resident)
            pl.BlockSpec(memory_space=pltpu.MemorySpace.SMEM),   # output bias (SMEM scalar)
        ],
        out_specs=pl.BlockSpec((1, tb), lambda i: (0, i)),       # lane-dense output slab
        compiler_params=pltpu.CompilerParams(
            dimension_semantics=("parallel",),
            vmem_limit_bytes=vmem_limit,
        ),
        cost_estimate=cost,
    )(x_in, w1t, b1c, w2c, b2s)

    # Back to the (B, 1) layout of nn.Linear(hidden, 1).
    return out_t[0, :B].reshape(B, 1)


if __name__ == "__main__":
    # Small shapes consistent with the module's forward: batch=8, input_dim=16, hidden=32.
    B, D, H = 8, 16, 32

    key = jax.random.PRNGKey(0)
    kx, kw1, kb1, kw2, kb2 = jax.random.split(key, 5)

    x = jax.random.normal(kx, (B, D), dtype=jnp.float32)
    # Deterministic synthetic parameters (shapes from nn.Linear(D, H) / nn.Linear(H, 1)).
    w1 = jax.random.normal(kw1, (D, H), dtype=jnp.float32) * 0.1   # layer1.weight^T
    b1 = jax.random.normal(kb1, (1, H), dtype=jnp.float32) * 0.1   # layer1.bias
    w2 = jax.random.normal(kw2, (H, 1), dtype=jnp.float32) * 0.1   # output.weight^T
    b2 = jax.random.normal(kb2, (1, 1), dtype=jnp.float32) * 0.1   # output.bias

    def ref_forward(x, activation):
        h = x @ w1 + b1
        h = _apply_activation(h, activation)
        return h @ w2 + b2

    for act in ("relu", "tanh", "mish"):
        out = simple_nn_forward(x, w1, b1, w2, b2, activation=act)
        out = jax.block_until_ready(out)
        ref = ref_forward(x, act)
        assert out.shape == (B, 1), (act, out.shape)
        assert jnp.allclose(out, ref, atol=1e-5, rtol=1e-5), act

    print("KERNEL_OK")
</pallas_src>

<mosaic_0001>
module attributes {stable_mosaic.version = 11 : i64} {
  func.func @simple_nn_kernel(%arg0: i32, %arg1: memref<128x16xf32, #tpu.memory_space<vmem>>, %arg2: memref<32x16xf32, #tpu.memory_space<vmem>>, %arg3: memref<32x1xf32, #tpu.memory_space<vmem>>, %arg4: memref<32x1xf32, #tpu.memory_space<vmem>>, %arg5: memref<1x1xf32, #tpu.memory_space<smem>>, %arg6: memref<1x128xf32, #tpu.memory_space<vmem>>) attributes {dimension_semantics = [#tpu.dimension_semantics<parallel>], iteration_bounds = array<i64: 1>, scalar_prefetch = 0 : i64, scratch_operands = 0 : i64, tpu.core_type = #tpu.core_type<tc>, window_params = [{transform_indices = @transform_0, window_bounds = array<i64: 128, 16>}, {pipeline_mode = #tpu.pipeline_mode<synchronous>, transform_indices = @transform_1, window_bounds = array<i64: 32, 16>}, {pipeline_mode = #tpu.pipeline_mode<synchronous>, transform_indices = @transform_2, window_bounds = array<i64: 32, 1>}, {pipeline_mode = #tpu.pipeline_mode<synchronous>, transform_indices = @transform_3, window_bounds = array<i64: 32, 1>}, {transform_indices = @transform_4, window_bounds = array<i64: 1, 1>}, {transform_indices = @transform_5, window_bounds = array<i64: 1, 128>}]} {
    %c0 = arith.constant 0 : index
    %c0_0 = arith.constant 0 : index
    %0 = vector.load %arg2[%c0, %c0_0] : memref<32x16xf32, #tpu.memory_space<vmem>>, vector<32x16xf32>
    %c0_1 = arith.constant 0 : index
    %c0_2 = arith.constant 0 : index
    %1 = vector.load %arg1[%c0_1, %c0_2] : memref<128x16xf32, #tpu.memory_space<vmem>>, vector<128x16xf32>
    %cst = arith.constant dense<0.000000e+00> : vector<32x128xf32>
    %2 = tpu.matmul %0, %1, %cst {dimension_numbers = #tpu.dot_dimension_numbers<[1], [1], [0], [0], [0, 0, 1, 0], [], []>} : vector<32x16xf32>, vector<128x16xf32>, vector<32x128xf32> -> vector<32x128xf32>
    %c0_3 = arith.constant 0 : index
    %c0_4 = arith.constant 0 : index
    %3 = vector.load %arg3[%c0_3, %c0_4] : memref<32x1xf32, #tpu.memory_space<vmem>>, vector<32x1xf32>
    %4 = vector.broadcast %3 : vector<32x1xf32> to vector<32x128xf32>
    %5 = arith.addf %2, %4 : vector<32x128xf32>
    %cst_5 = arith.constant 0.000000e+00 : f32
    %6 = vector.broadcast %cst_5 : f32 to vector<32x128xf32>
    %7 = arith.maximumf %5, %6 : vector<32x128xf32>
    %c0_6 = arith.constant 0 : index
    %c0_7 = arith.constant 0 : index
    %8 = vector.load %arg4[%c0_6, %c0_7] : memref<32x1xf32, #tpu.memory_space<vmem>>, vector<32x1xf32>
    %9 = vector.broadcast %8 : vector<32x1xf32> to vector<32x128xf32>
    %10 = arith.mulf %7, %9 : vector<32x128xf32>
    %cst_8 = arith.constant dense<0.000000e+00> : vector<128xf32>
    %11 = vector.multi_reduction <add>, %10, %cst_8 [0] : vector<32x128xf32> to vector<128xf32>
    %12 = vector.shape_cast %11 : vector<128xf32> to vector<1x128xf32>
    %c0_9 = arith.constant 0 : index
    %c0_10 = arith.constant 0 : index
    %13 = memref.load %arg5[%c0_9, %c0_10] : memref<1x1xf32, #tpu.memory_space<smem>>
    %14 = vector.broadcast %13 : f32 to vector<1x128xf32>
    %15 = arith.addf %12, %14 : vector<1x128xf32>
    %c0_11 = arith.constant 0 : index
    %c0_12 = arith.constant 0 : index
    %16 = vector.load %arg6[%c0_11, %c0_12] : memref<1x128xf32, #tpu.memory_space<vmem>>, vector<1x128xf32>
    tpu.vector_store %arg6[%c0_11, %c0_12], %15 {strides = array<i32>} : memref<1x128xf32, #tpu.memory_space<vmem>>, vector<1x128xf32>,
    return
  }
  func.func @transform_0(%arg0: i32) -> (i32, i32) {
    %c0_i32 = arith.constant 0 : i32
    %c0_i32_0 = arith.constant 0 : i32
    return %arg0, %c0_i32 : i32, i32
  }
  func.func @transform_1(%arg0: i32) -> (i32, i32) {
    %c0_i32 = arith.constant 0 : i32
    %c0_i32_0 = arith.constant 0 : i32
    %c0_i32_1 = arith.constant 0 : i32
    return %c0_i32, %c0_i32_0 : i32, i32
  }
  func.func @transform_2(%arg0: i32) -> (i32, i32) {
    %c0_i32 = arith.constant 0 : i32
    %c0_i32_0 = arith.constant 0 : i32
    %c0_i32_1 = arith.constant 0 : i32
    return %c0_i32, %c0_i32_0 : i32, i32
  }
  func.func @transform_3(%arg0: i32) -> (i32, i32) {
    %c0_i32 = arith.constant 0 : i32
    %c0_i32_0 = arith.constant 0 : i32
    %c0_i32_1 = arith.constant 0 : i32
    return %c0_i32, %c0_i32_0 : i32, i32
  }
  func.func @transform_4(%arg0: i32) -> (i32, i32) {
    %c0_i32 = arith.constant 0 : i32
    %c0_i32_0 = arith.constant 0 : i32
    %c0_i32_1 = arith.constant 0 : i32
    return %c0_i32, %c0_i32_0 : i32, i32
  }
  func.func @transform_5(%arg0: i32) -> (i32, i32) {
    %c0_i32 = arith.constant 0 : i32
    %c0_i32_0 = arith.constant 0 : i32
    return %c0_i32, %arg0 : i32, i32
  }
}

</mosaic_0001>

<bundles_post_ra>
// kernel: tpu_custom_call.1
= control target key start
LH: loop header
LB: loop body
LE: loop exit
PB: predicated region body
PF: predicated region fallthrough
CT: control target
= control target key end

     0   :  { %vm66_vm0 = vcmask 130048   ;;  %v441_v6 = vmov 0   ;;  %s646_s0 = inlined_call_operand.vmem [shape: f32[128,16], index: 0, kind: input, shape index: {}]   ;;  %s647_s1 = inlined_call_operand.vmem [shape: f32[32,16], index: 1, kind: input, shape index: {}]   ;;  %s648_s2 = inlined_call_operand.vmem [shape: f32[32,1], index: 2, kind: input, shape index: {}]   ;;  %s649_s3 = inlined_call_operand.vmem [shape: f32[32,1], index: 3, kind: input, shape index: {}]   ;;  %s650_s4 = inlined_call_operand.<no memory space> [shape: f32[1,1], index: 4, kind: input, shape index: {}]   ;;  %s651_s5 = inlined_call_operand.hbm [shape: f32[1,128], index: 5, kind: output, shape index: {}]  }
   0x1   :  { %v26_v0 = vld [vmem:[%s646_s0] sm:$0xff]  ;;  %v27_v1 = vld [vmem:[%s646_s0 + $0x8] sm:$0xff]  ;;  %v28_v2 = vld [vmem:[%s646_s0 + $0x10] sm:$0xff]  ;;  %415 = vset.pattern.permute.xlu0 %v441_v6  ;;  %416 = vset.pattern.permute.xlu1 %v441_v6 }
   0x2   :  { %v349_v3 = vpack.c.bf16 %v27_v1, %v26_v0  ;;  %vm484_vm1 = vmpackc.low %vm66_vm0, %vm66_vm0  ;;  %v29_v5 = vld [vmem:[%s646_s0 + $0x18] sm:$0xff]  ;;  %v22_v8 = vld [vmem:[%s647_s1] sm:$0xff] }
   0x3   :  { %v355_v7 = vpack.c.bf16 %v29_v5, %v28_v2  ;;  %v30_v9 = vld [vmem:[%s646_s0 + $0x20] sm:$0xff]  ;;  %v31_v10 = vld [vmem:[%s646_s0 + $0x28] sm:$0xff]  ;;  %343 = vmatprep.mubr.msk.f32.mxu0 %vm66_vm0, %v22_v8  ;;  %v24_v11 = vld [vmem:[%s647_s1 + $0x10] sm:$0xff] }
   0x4   :  { %351 = vmatprep.subr.msk.bf16.mxu0 %vm484_vm1, %v349_v3  ;;  %397 = vmatprep.subr.msk.bf16.mxu1 %vm484_vm1, %v349_v3  ;;  %v42_v12 = vld [vmem:[%s648_s2] sm:$0xff]  ;;  %v44_v13 = vld [vmem:[%s648_s2 + $0x10] sm:$0xff]  ;;  %v361_v14 = vpack.c.bf16 %v31_v10, %v30_v9 }
   0x5   :  { %354 = vmatpush3.bf16.xpose.msk.msra.mxu0 %vm484_vm1, %v349_v3  ;;  %405 = vmatpush3.bf16.xpose.msk.msra.mxu1 %vm484_vm1, %v349_v3 }
   0x6   :  { %357 = vmatprep.subr.msk.bf16.mxu0 %vm484_vm1, %v355_v7  ;;  %398 = vmatprep.subr.msk.bf16.mxu1 %vm484_vm1, %v355_v7 }
   0x7   :  { %346 = vmatprep.mubr.msk.f32.mxu1 %vm66_vm0, %v24_v11  ;;  %48 = vperm.xlu0 %415, %v42_v12  }
   0x8   :  { %58 = vperm.xlu1 %416, %v44_v13  }
   0x9   :  { %11 = vsyncpa [#allocation4], 0  ;;  %v43_v15 = vld [vmem:[%s648_s2 + $0x8] sm:$0xff]  ;;  %v45_v16 = vld [vmem:[%s648_s2 + $0x18] sm:$0xff]  ;;  %v254_v6 = vstv %s650_s4  ;;  %s442_s21 = smov [#allocation3]  }
   0xa   :  { %v32_v17 = vld [vmem:[%s646_s0 + $0x30] sm:$0xff]  ;;  %v33_v18 = vld [vmem:[%s646_s0 + $0x38] sm:$0xff]  ;;  %v216_v19 = vld [vmem:[%s649_s3] sm:$0xff]  ;;  %s263_s22 = sshll.u32 %s442_s21, 4  ;;  %s264_s22 = int_to_ptr.vmem [resolvable:$true] %s263_s22 }
   0xb   :  { %53 = vperm.xlu0 %415, %v43_v15   ;;  %v217_v20 = vld [vmem:[%s649_s3 + $0x8] sm:$0xff]  ;;  %v367_v21 = vpack.c.bf16 %v33_v18, %v32_v17  ;;  %v218_v22 = vld [vmem:[%s649_s3 + $0x10] sm:$0xff]  ;;  %v219_v23 = vld [vmem:[%s649_s3 + $0x18] sm:$0xff]  ;;  %s417_s23 = scalar_lea.vmem %s264_s22, 16  ;;  %s421_s24 = scalar_lea.vmem %s264_s22, 32 }
   0xc   :  { %63 = vperm.xlu1 %416, %v45_v16   ;;  %v34_v24 = vld [vmem:[%s646_s0 + $0x40] sm:$0xff]  ;;  %v35_v25 = vld [vmem:[%s646_s0 + $0x48] sm:$0xff]  ;;  %v36_v27 = vld [vmem:[%s646_s0 + $0x50] sm:$0xff]  ;;  %p418_p0 = scmp.ne.s32.totalorder %s264_s22, %s417_s23  ;;  %p422_p1 = scmp.lt.s32.totalorder %s264_s22, %s264_s22 }
   0xd   :  { %360 = vmatpush3.bf16.xpose.msk.msra.mxu0 %vm484_vm1, %v355_v7  ;;  %406 = vmatpush3.bf16.xpose.msk.msra.mxu1 %vm484_vm1, %v355_v7  ;;  %v373_v26 = vpack.c.bf16 %v35_v25, %v34_v24  ;;  %v37_v28 = vld [vmem:[%s646_s0 + $0x58] sm:$0xff]  ;;  %v38_v30 = vld [vmem:[%s646_s0 + $0x60] sm:$0xff]  ;;  %v39_v31 = vld [vmem:[%s646_s0 + $0x68] sm:$0xff]  ;;  %p423_p2 = scmp.lt.s32.totalorder %s421_s24, %s417_s23 }
   0xe   :  { %363 = vmatprep.subr.msk.bf16.mxu0 %vm484_vm1, %v361_v14  ;;  %399 = vmatprep.subr.msk.bf16.mxu1 %vm484_vm1, %v361_v14  ;;  %v379_v29 = vpack.c.bf16 %v37_v28, %v36_v27  ;;  %v385_v32 = vpack.c.bf16 %v39_v31, %v38_v30  ;;  %v40_v33 = vld [vmem:[%s646_s0 + $0x70] sm:$0xff]  ;;  %v41_v34 = vld [vmem:[%s646_s0 + $0x78] sm:$0xff]  ;;  %v23_v36 = vld [vmem:[%s647_s1 + $0x8] sm:$0xff] }
   0xf   :  { %222 = vperm.xlu0 %415, %v216_v19   ;;  %v391_v35 = vpack.c.bf16 %v41_v34, %v40_v33  ;;  %v25_v37 = vld [vmem:[%s647_s1 + $0x18] sm:$0xff]  ;;  %p424_p3 = por %p423_p2, %p422_p1 }
  0x10   :  { %227 = vperm.xlu1 %416, %v217_v20  }
  0x11   :  { %p425_p4 = pnand %p424_p3, %p418_p0 }
  0x13   :  { %232 = vperm.xlu0 %415, %v218_v22  }
  0x14   :  { %237 = vperm.xlu1 %416, %v219_v23  }
  0x15   :  { %366 = vmatpush3.bf16.xpose.msk.msra.mxu0 %vm484_vm1, %v361_v14  ;;  %407 = vmatpush3.bf16.xpose.msk.msra.mxu1 %vm484_vm1, %v361_v14 }
  0x16   :  { %369 = vmatprep.subr.msk.bf16.mxu0 %vm484_vm1, %v367_v21  ;;  %400 = vmatprep.subr.msk.bf16.mxu1 %vm484_vm1, %v367_v21 }
  0x1d   :  { %372 = vmatpush3.bf16.xpose.msk.msra.mxu0 %vm484_vm1, %v367_v21  ;;  %408 = vmatpush3.bf16.xpose.msk.msra.mxu1 %vm484_vm1, %v367_v21 }
  0x1e   :  { %375 = vmatprep.subr.msk.bf16.mxu0 %vm484_vm1, %v373_v26  ;;  %401 = vmatprep.subr.msk.bf16.mxu1 %vm484_vm1, %v373_v26 }
  0x25   :  { %378 = vmatpush3.bf16.xpose.msk.msra.mxu0 %vm484_vm1, %v373_v26  ;;  %409 = vmatpush3.bf16.xpose.msk.msra.mxu1 %vm484_vm1, %v373_v26 }
  0x26   :  { %381 = vmatprep.subr.msk.bf16.mxu0 %vm484_vm1, %v379_v29  ;;  %402 = vmatprep.subr.msk.bf16.mxu1 %vm484_vm1, %v379_v29 }
  0x2d   :  { %384 = vmatpush3.bf16.xpose.msk.msra.mxu0 %vm484_vm1, %v379_v29  ;;  %410 = vmatpush3.bf16.xpose.msk.msra.mxu1 %vm484_vm1, %v379_v29 }
  0x2e   :  { %387 = vmatprep.subr.msk.bf16.mxu0 %vm484_vm1, %v385_v32  ;;  %403 = vmatprep.subr.msk.bf16.mxu1 %vm484_vm1, %v385_v32 }
  0x35   :  { %390 = vmatpush3.bf16.xpose.msk.msra.mxu0 %vm484_vm1, %v385_v32  ;;  %411 = vmatpush3.bf16.xpose.msk.msra.mxu1 %vm484_vm1, %v385_v32 }
  0x36   :  { %393 = vmatprep.subr.msk.bf16.mxu0 %vm484_vm1, %v391_v35  ;;  %404 = vmatprep.subr.msk.bf16.mxu1 %vm484_vm1, %v391_v35 }
  0x3d   :  { %396 = vmatpush3.bf16.xpose.msk.msra.mxu0 %vm484_vm1, %v391_v35  ;;  %412 = vmatpush3.bf16.xpose.msk.msra.mxu1 %vm484_vm1, %v391_v35 }
  0x44   :  { %344 = vmatmul.mubr.msk.f32.vlgmr.msra.gmra.mrb[0].mxu0 %vm66_vm0, %v23_v36  ;;  %347 = vmatmul.mubr.msk.f32.vlgmr.msra.gmra.mrb[0].mxu1 %vm66_vm0, %v25_v37 }
  0x86   :  { %v49_v38 = vpop.permute.xlu0 %48 }
  0x87   :  { %v59_v39 = vpop.permute.xlu1 %58 }
  0x8a   :  { %v54_v40 = vpop.permute.xlu0 %53 }
  0x8b   :  { %v64_v41 = vpop.permute.xlu1 %63 }
  0x8e   :  { %v223_v42 = vpop.permute.xlu0 %222 }
  0x8f   :  { %v228_v51 = vpop.permute.xlu1 %227 }
  0x92   :  { %v233_v58 = vpop.permute.xlu0 %232 }
  0x93   :  { %v238_v61 = vpop.permute.xlu1 %237 }
 0x117   :  { %v345_v43 = vpop.f32.mrb[0].mxu0  ;;  %v348_v44 = vpop.f32.mrb[0].mxu1 }
 0x118   :  { %v199_v45 = vadd.f32 %v345_v43, %v54_v40  ;;  %v193_v46 = vpop.f32.mrb[1].mxu0  ;;  %v203_v47 = vpop.f32.mrb[1].mxu1  ;;  %v209_v48 = vadd.f32 %v348_v44, %v64_v41 }
 0x119   :  { %v194_v49 = vadd.f32 %v193_v46, %v49_v38  ;;  %v204_v50 = vadd.f32 %v203_v47, %v59_v39 }
 0x11a   :  { %v213_v52 = vmax.f32 %v199_v45, 0.0  ;;  %v215_v56 = vmax.f32 %v209_v48, 0.0 }
 0x11b   :  { %v212_v53 = vmax.f32 %v194_v49, 0.0  ;;  %v214_v54 = vmax.f32 %v204_v50, 0.0 }
 0x11c   :  { %v241_v55 = vmul.f32 %v228_v51, %v213_v52  ;;  %v243_v62 = vmul.f32 %v238_v61, %v215_v56 }
 0x11d   :  { %v240_v57 = vmul.f32 %v223_v42, %v212_v53  ;;  %v242_v60 = vmul.f32 %v233_v58, %v214_v54 }
 0x11f   :  { %v244_v59 = vadd.f32 %v241_v55, %v240_v57 }
 0x121   :  { %v245_v63 = vadd.f32 %v244_v59, %v242_v60 }
 0x123   :  { %v246_v0 = vadd.f32 %v245_v63, %v243_v62 }
 0x125   :  { %v247_v1 = vrot.slane %v246_v0, 4 }
 0x127   :  { %v248_v2 = vadd.f32 %v247_v1, %v246_v0 }
 0x129   :  { %v249_v3 = vrot.slane %v248_v2, 2 }
 0x12b   :  { %v250_v4 = vadd.f32 %v249_v3, %v248_v2 }
 0x12d   :  { %v251_v5 = vrot.slane %v250_v4, 1 }
 0x12f   :  { %v252_v7 = vadd.f32 %v251_v5, %v250_v4 }
 0x131   :  { %v255_v8 = vadd.f32 %v254_v6, %v252_v7 }
 0x133   :  { %256 = vst [vmem:[#allocation3] sm:$0x1] %v255_v8 }
 0x134   :  { %428 = shalt.err (!%p425_p4)
}
 0x135   :  { %s429_s27 = scalar_lea.hbm %s651_s5, 16 }
 0x136   :  { %p430_p5 = scmp.ne.s32.totalorder %s651_s5, %s429_s27  ;;  %p433_p6 = scmp.lt.u32.totalorder %s429_s27, %s651_s5 }
 0x138   :  { %p435_p7 = pnand %p433_p6, %p430_p5 }
 0x13a   :  { %438 = shalt.err (!%p435_p7)
}
 0x13b   :  { %266 = dma.vmem_to_hbm [thread:$0]  %s264_s22, 16, %s651_s5, [#allocation4]  }
 0x13c   :  { %439 = dma.done.wait [#allocation4], 16  }
 0x13d   :  { %440 = vsyncadd [#allocation4], 4294967280 }
 0x13e   :  { %270 = vsyncpa [#allocation4], 1 }

</bundles_post_ra>
